<compile_context>
chip_gen: v5e
topology: v5e:2x2
jax: 0.10.0
libtpu: 0.0.40
codegen_flags: <defaults>
</compile_context>

<pallas_src>
import functools

import jax
import jax.numpy as jnp
from jax import lax
from jax.experimental import pallas as pl
from jax.experimental.pallas import tpu as pltpu


def _round_up(x: int, m: int) -> int:
    return ((x + m - 1) // m) * m


def _pick_tile(padded_dim: int, unit: int, target: int) -> int:
    """Largest t = unit*g such that g divides (padded_dim // unit) and t <= target."""
    nb = padded_dim // unit
    best = 1
    for g in range(1, nb + 1):
        if nb % g == 0 and unit * g <= target:
            best = g
    return unit * best


# ---------------------------------------------------------------------------
# Kernels
# ---------------------------------------------------------------------------
def _linear_kernel_single(x_ref, w_ref, b_ref, o_ref):
    """Single K pass: whole (padded) K lives in VMEM. x:(tm,K) w:(tn,K)."""
    acc = lax.dot_general(
        x_ref[...],
        w_ref[...],
        dimension_numbers=(((1,), (1,)), ((), ())),  # contract last dims (x @ w^T)
        preferred_element_type=jnp.float32,
    )
    o_ref[...] = (acc + b_ref[...].astype(jnp.float32)).astype(o_ref.dtype)


def _linear_kernel_tiled_k(x_ref, w_ref, b_ref, o_ref, acc_ref):
    """K reduced along grid axis 2 with an f32 VMEM accumulator."""
    k = pl.program_id(2)

    @pl.when(k == 0)
    def _init():
        acc_ref[...] = jnp.zeros_like(acc_ref)

    acc_ref[...] += lax.dot_general(
        x_ref[...],
        w_ref[...],
        dimension_numbers=(((1,), (1,)), ((), ())),
        preferred_element_type=jnp.float32,
    )

    @pl.when(k == pl.num_programs(2) - 1)
    def _finalize():
        o_ref[...] = (acc_ref[...] + b_ref[...].astype(jnp.float32)).astype(
            o_ref.dtype
        )


# ---------------------------------------------------------------------------
# Wrapper
# ---------------------------------------------------------------------------
@jax.jit
def linear_forward(x, weight, bias):
    """y = x @ weight.T + bias, matching torch.nn.Linear semantics.

    x:      (B, in_size)
    weight: (out_size, in_size)   (torch layout, NOT transposed here)
    bias:   (out_size,)
    """
    B, in_size = x.shape
    out_size, _ = weight.shape
    itemsize = 4  # f32 datapath

    # Pad only to hardware minimums.
    Mp = _round_up(B, 8)
    Np = _round_up(out_size, 128)
    Kp = _round_up(in_size, 128)

    BUDGET = 36 * (1 << 20)  # double-buffered VMEM budget (v7x-safe)

    def footprint(tm, tn, tk, with_acc):
        b = 2 * itemsize * (tm * tk + tn * tk + tm * tn) + 2 * itemsize * tn
        if with_acc:
            b += 4 * tm * tn  # f32 accumulator scratch
        return b

    tm = _pick_tile(Mp, 8, 512)

    # Prefer a single K pass (no accumulator RMW, no K grid-step overhead).
    single_k = False
    tn = tk = None
    for tn_target in (1024, 512, 256):
        tn_c = _pick_tile(Np, 128, tn_target)
        if footprint(tm, tn_c, Kp, False) <= BUDGET:
            tn, tk, single_k = tn_c, Kp, True
            break
    if not single_k:
        tn = _pick_tile(Np, 128, 512)
        tk = _pick_tile(Kp, 128, 2048)
        while footprint(tm, tn, tk, True) > BUDGET and tk > 128:
            tk = _pick_tile(Kp, 128, tk - 128)
        while footprint(tm, tn, tk, True) > BUDGET and tn > 128:
            tn = _pick_tile(Np, 128, tn - 128)
        while footprint(tm, tn, tk, True) > BUDGET and tm > 8:
            tm = _pick_tile(Mp, 8, tm - 8)

    # Zero-pad only when required (zeros contribute nothing to dot / bias).
    xp = x
    if Mp != B or Kp != in_size:
        xp = jnp.pad(x, ((0, Mp - B), (0, Kp - in_size)))
    wp = weight
    if Np != out_size or Kp != in_size:
        wp = jnp.pad(weight, ((0, Np - out_size), (0, Kp - in_size)))
    bp = bias.reshape(1, out_size)
    if Np != out_size:
        bp = jnp.pad(bp, ((0, 0), (0, Np - out_size)))

    cost = pl.CostEstimate(
        flops=2 * Mp * Np * Kp,
        bytes_accessed=itemsize * (Mp * Kp + Np * Kp + Mp * Np + Np),
        transcendentals=0,
    )

    # GEMV-like regime: tiny batch + a long weight stream -> deepen buffering.
    n_w_blocks = (Np // tn) * (1 if single_k else Kp // tk)
    extra_buf = itemsize * tn * tk
    use_deep_w = (
        tm <= 16
        and n_w_blocks >= 3
        and footprint(tm, tn, tk, not single_k) + extra_buf <= BUDGET
    )
    w_kwargs = {"pipeline_mode": pl.Buffered(3)} if use_deep_w else {}

    if single_k:
        grid = (Mp // tm, Np // tn)
        in_specs = [
            pl.BlockSpec((tm, Kp), lambda i, j: (i, 0)),            # x tile
            pl.BlockSpec((tn, Kp), lambda i, j: (j, 0), **w_kwargs),  # W tile (torch layout)
            pl.BlockSpec((1, tn), lambda i, j: (0, j)),             # bias tile
        ]
        out_spec = pl.BlockSpec((tm, tn), lambda i, j: (i, j))
        scratch = []
        kernel = _linear_kernel_single
        dims = ("parallel", "parallel")
    else:
        grid = (Mp // tm, Np // tn, Kp // tk)
        in_specs = [
            pl.BlockSpec((tm, tk), lambda i, j, k: (i, k)),
            pl.BlockSpec((tn, tk), lambda i, j, k: (j, k), **w_kwargs),
            pl.BlockSpec((1, tn), lambda i, j, k: (0, j)),
        ]
        out_spec = pl.BlockSpec((tm, tn), lambda i, j, k: (i, j))
        scratch = [pltpu.VMEM((tm, tn), jnp.float32)]
        kernel = _linear_kernel_tiled_k
        dims = ("parallel", "parallel", "arbitrary")

    out_padded = pl.pallas_call(
        kernel,
        out_shape=jax.ShapeDtypeStruct((Mp, Np), x.dtype),
        grid_spec=pltpu.PrefetchScalarGridSpec(
            num_scalar_prefetch=0,
            grid=grid,
            in_specs=in_specs,
            out_specs=out_spec,
            scratch_shapes=scratch,
        ),
        compiler_params=pltpu.CompilerParams(
            dimension_semantics=dims,
            vmem_limit_bytes=48 * (1 << 20),
        ),
        cost_estimate=cost,
    )(xp, wp, bp)

    if Mp == B and Np == out_size:
        return out_padded
    return out_padded[:B, :out_size]


if __name__ == "__main__":
    key = jax.random.PRNGKey(0)
    kx, kw, kb = jax.random.split(key, 3)

    batch, in_size, out_size = 8, 32, 16

    x = jax.random.normal(kx, (batch, in_size), dtype=jnp.float32)
    # Deterministic init mimicking nn.Linear's uniform(-1/sqrt(in), 1/sqrt(in)).
    bound = 1.0 / (in_size ** 0.5)
    weight = jax.random.uniform(
        kw, (out_size, in_size), dtype=jnp.float32, minval=-bound, maxval=bound
    )
    bias = jax.random.uniform(
        kb, (out_size,), dtype=jnp.float32, minval=-bound, maxval=bound
    )

    y = linear_forward(x, weight, bias)
    jax.block_until_ready(y)

    # Correctness check against plain-JAX reference (torch.nn.Linear semantics).
    y_ref = x @ weight.T + bias
    assert y.shape == (batch, out_size)
    assert jnp.allclose(y, y_ref, atol=1e-5, rtol=1e-5)

    print("KERNEL_OK")
</pallas_src>

<mosaic_0001>
module attributes {stable_mosaic.version = 11 : i64} {
  func.func @_linear_kernel_single(%arg0: i32, %arg1: i32, %arg2: memref<8x128xf32, #tpu.memory_space<vmem>>, %arg3: memref<128x128xf32, #tpu.memory_space<vmem>>, %arg4: memref<1x128xf32, #tpu.memory_space<vmem>>, %arg5: memref<8x128xf32, #tpu.memory_space<vmem>>) attributes {dimension_semantics = [#tpu.dimension_semantics<parallel>, #tpu.dimension_semantics<parallel>], iteration_bounds = array<i64: 1, 1>, scalar_prefetch = 0 : i64, scratch_operands = 0 : i64, tpu.core_type = #tpu.core_type<tc>, window_params = [{transform_indices = @transform_0, window_bounds = array<i64: 8, 128>}, {transform_indices = @transform_1, window_bounds = array<i64: 128, 128>}, {transform_indices = @transform_2, window_bounds = array<i64: 1, 128>}, {transform_indices = @transform_3, window_bounds = array<i64: 8, 128>}]} {
    %c0 = arith.constant 0 : index
    %c0_0 = arith.constant 0 : index
    %0 = vector.load %arg2[%c0, %c0_0] : memref<8x128xf32, #tpu.memory_space<vmem>>, vector<8x128xf32>
    %c0_1 = arith.constant 0 : index
    %c0_2 = arith.constant 0 : index
    %1 = vector.load %arg3[%c0_1, %c0_2] : memref<128x128xf32, #tpu.memory_space<vmem>>, vector<128x128xf32>
    %cst = arith.constant dense<0.000000e+00> : vector<8x128xf32>
    %2 = tpu.matmul %0, %1, %cst {dimension_numbers = #tpu.dot_dimension_numbers<[1], [1], [0], [0], [0, 0, 1, 0], [], []>} : vector<8x128xf32>, vector<128x128xf32>, vector<8x128xf32> -> vector<8x128xf32>
    %c0_3 = arith.constant 0 : index
    %c0_4 = arith.constant 0 : index
    %3 = vector.load %arg4[%c0_3, %c0_4] : memref<1x128xf32, #tpu.memory_space<vmem>>, vector<1x128xf32>
    %4 = vector.broadcast %3 : vector<1x128xf32> to vector<8x128xf32>
    %5 = arith.addf %2, %4 : vector<8x128xf32>
    %c0_5 = arith.constant 0 : index
    %c0_6 = arith.constant 0 : index
    %6 = vector.load %arg5[%c0_5, %c0_6] : memref<8x128xf32, #tpu.memory_space<vmem>>, vector<8x128xf32>
    tpu.vector_store %arg5[%c0_5, %c0_6], %5 {strides = array<i32>} : memref<8x128xf32, #tpu.memory_space<vmem>>, vector<8x128xf32>,
    return
  }
  func.func @transform_0(%arg0: i32, %arg1: i32) -> (i32, i32) {
    %c0_i32 = arith.constant 0 : i32
    %c0_i32_0 = arith.constant 0 : i32
    return %arg0, %c0_i32 : i32, i32
  }
  func.func @transform_1(%arg0: i32, %arg1: i32) -> (i32, i32) {
    %c0_i32 = arith.constant 0 : i32
    %c0_i32_0 = arith.constant 0 : i32
    return %arg1, %c0_i32 : i32, i32
  }
  func.func @transform_2(%arg0: i32, %arg1: i32) -> (i32, i32) {
    %c0_i32 = arith.constant 0 : i32
    %c0_i32_0 = arith.constant 0 : i32
    return %c0_i32, %arg1 : i32, i32
  }
  func.func @transform_3(%arg0: i32, %arg1: i32) -> (i32, i32) {
    %c0_i32 = arith.constant 0 : i32
    return %arg0, %arg1 : i32, i32
  }
}

</mosaic_0001>

<bundles_post_ra>
// kernel: linear_forward.1
= control target key start
LH: loop header
LB: loop body
LE: loop exit
PB: predicated region body
PF: predicated region fallthrough
CT: control target
= control target key end

     0   :  { %s179_s0 = inlined_call_operand.vmem [shape: f32[8,128], index: 0, kind: input, shape index: {}]   ;;  %s180_s1 = inlined_call_operand.vmem [shape: f32[128,128], index: 1, kind: input, shape index: {}]   ;;  %s181_s2 = inlined_call_operand.vmem [shape: f32[1,128], index: 2, kind: input, shape index: {}]   ;;  %s182_s3 = inlined_call_operand.hbm [shape: f32[8,128], index: 3, kind: output, shape index: {}]  }
   0x1   :  { %v31_v0 = vld [vmem:[%s180_s1 + $0x78] sm:$0xff]  ;;  %v30_v1 = vld [vmem:[%s180_s1 + $0x70] sm:$0xff] }
   0x2   :  { %36 = vmatpush.xpose.msra.mxu0 %v31_v0 }
   0x3   :  { %8 = vsyncpa [#allocation3], 0  ;;  %v29_v2 = vld [vmem:[%s180_s1 + $0x68] sm:$0xff]  ;;  %v28_v3 = vld [vmem:[%s180_s1 + $0x60] sm:$0xff]  ;;  %s101_s21 = smov [#allocation2]   ;;  %s64_s25 = sshll.u32 %s182_s3, 4  ;;  %s65_s25 = int_to_ptr.hbm [resolvable:$true] %s64_s25 }
   0x4   :  { %v27_v4 = vld [vmem:[%s180_s1 + $0x58] sm:$0xff]  ;;  %v26_v5 = vld [vmem:[%s180_s1 + $0x50] sm:$0xff]  ;;  %v25_v6 = vld [vmem:[%s180_s1 + $0x48] sm:$0xff]  ;;  %s62_s22 = sshll.u32 %s101_s21, 4  ;;  %s63_s22 = int_to_ptr.vmem [resolvable:$true] %s62_s22 }
   0x5   :  { %v24_v7 = vld [vmem:[%s180_s1 + $0x40] sm:$0xff]  ;;  %v23_v8 = vld [vmem:[%s180_s1 + $0x38] sm:$0xff]  ;;  %v22_v9 = vld [vmem:[%s180_s1 + $0x30] sm:$0xff] }
   0x6   :  { %37 = vmatpush.xpose.msra.mxu0 %v30_v1  ;;  %v21_v10 = vld [vmem:[%s180_s1 + $0x28] sm:$0xff]  ;;  %v20_v11 = vld [vmem:[%s180_s1 + $0x20] sm:$0xff]  ;;  %v19_v12 = vld [vmem:[%s180_s1 + $0x18] sm:$0xff] }
   0x7   :  { %v18_v13 = vld [vmem:[%s180_s1 + $0x10] sm:$0xff]  ;;  %v17_v14 = vld [vmem:[%s180_s1 + $0x8] sm:$0xff]  ;;  %v16_v15 = vld [vmem:[%s180_s1] sm:$0xff] }
   0x8   :  { %v15_v16 = vld [vmem:[%s179_s0] sm:$0xff] }
   0x9   :  { %v74_v17 = vld [vmem:[%s181_s2] ss:$0 sm:$0xff] }
   0xa   :  { %38 = vmatpush.xpose.msra.mxu0 %v29_v2 }
   0xe   :  { %39 = vmatpush.xpose.msra.mxu0 %v28_v3 }
  0x12   :  { %40 = vmatpush.xpose.msra.mxu0 %v27_v4 }
  0x16   :  { %41 = vmatpush.xpose.msra.mxu0 %v26_v5 }
  0x1a   :  { %42 = vmatpush.xpose.msra.mxu0 %v25_v6 }
  0x1e   :  { %43 = vmatpush.xpose.msra.mxu0 %v24_v7 }
  0x22   :  { %44 = vmatpush.xpose.msra.mxu0 %v23_v8 }
  0x26   :  { %45 = vmatpush.xpose.msra.mxu0 %v22_v9 }
  0x2a   :  { %46 = vmatpush.xpose.msra.mxu0 %v21_v10 }
  0x2e   :  { %47 = vmatpush.xpose.msra.mxu0 %v20_v11 }
  0x32   :  { %48 = vmatpush.xpose.msra.mxu0 %v19_v12 }
  0x36   :  { %49 = vmatpush.xpose.msra.mxu0 %v18_v13 }
  0x3a   :  { %50 = vmatpush.xpose.msra.mxu0 %v17_v14 }
  0x3e   :  { %51 = vmatpush.xpose.msra.mxu0 %v16_v15 }
  0x41   :  { %52 = vmatmul.f32.vlgmr.msra.gmra.mxu0 %v15_v16 }
  0xbe   :  { %v53_v18 = vpop.f32.mrf.mxu0 }
  0xbf   :  { %v54_v19 = vadd.f32 %v74_v17, %v53_v18 }
  0xc1   :  { %56 = vst [vmem:[#allocation2] sm:$0xff] %v54_v19 }
  0xc2   :  { %67 = dma.vmem_to_hbm [thread:$0]  %s63_s22, 128, %s65_s25, [#allocation3]  }
  0xc3   :  { %99 = dma.done.wait [#allocation3], 128  }
  0xc4   :  { %100 = vsyncadd [#allocation3], 4294967168 }
  0xc5   :  { %72 = vsyncpa [#allocation3], 1 }

</bundles_post_ra>
